<compile_context>
chip_gen: v7x
topology: tpu7x:2x2x1
jax: 0.10.0
libtpu: 0.0.40
codegen_flags: <defaults>
</compile_context>

<pallas_src>
import jax
import jax.numpy as jnp
from jax.experimental import pallas as pl
from jax.experimental.pallas import tpu as pltpu


def _round_up(v, m):
    return ((v + m - 1) // m) * m


# ---------------------------------------------------------------------------
# Kernels
# ---------------------------------------------------------------------------
def _target_kernel_single(x_ref, w_ref, o_ref):
    """Whole K in one tile: fused matmul + L2-normalize, no scratch."""
    acc = jnp.dot(x_ref[...], w_ref[...], preferred_element_type=jnp.float32)
    sq_sum = jnp.sum(acc * acc, axis=-1, keepdims=True)   # padded cols are 0
    inv_norm = jax.lax.rsqrt(sq_sum)                       # EUP, f32 epilogue
    # NOTE: rows that are exactly zero give inf/NaN, matching torch's
    # output/output.norm() (no eps in the reference).
    o_ref[...] = (acc * inv_norm).astype(o_ref.dtype)


def _target_kernel_multi(x_ref, w_ref, o_ref, acc_ref):
    """One (TB, D_out_pad) output tile; K (reduction) is the innermost grid axis."""
    k = pl.program_id(1)

    @pl.when(k == 0)
    def _():
        acc_ref[...] = jnp.zeros_like(acc_ref)

    acc_ref[...] += jnp.dot(
        x_ref[...], w_ref[...], preferred_element_type=jnp.float32
    )

    @pl.when(k == pl.num_programs(1) - 1)
    def _():
        acc = acc_ref[...]                                   # f32 (TB, D_out_pad)
        sq_sum = jnp.sum(acc * acc, axis=-1, keepdims=True)  # padded cols are 0
        inv_norm = jax.lax.rsqrt(sq_sum)
        o_ref[...] = (acc * inv_norm).astype(o_ref.dtype)


# ---------------------------------------------------------------------------
# Wrapper
# ---------------------------------------------------------------------------
def _pick_tiles(B, d_in_p, d_out_p, in_itemsize, out_itemsize):
    # Largest K tile <= 512 dividing the padded reduction dim.
    tk = next(c for c in (512, 384, 256, 128) if d_in_p % c == 0)
    # Largest batch tile that keeps the double-buffered tiles + accumulator
    # under a conservative VMEM budget (fewer grid steps, fewer weight fetches).
    budget = 24 << 20
    tb = None
    for cand in (512, 256, 128):
        if B >= cand:
            est = (2 * cand * tk * in_itemsize          # x tiles (double-buffered)
                   + 2 * tk * d_out_p * in_itemsize     # w tiles
                   + 2 * cand * d_out_p * out_itemsize  # out tiles
                   + cand * d_out_p * 4)                # f32 accumulator
            if est <= budget:
                tb = cand
                break
    if tb is None:
        tb = 128 if B >= 128 else _round_up(max(B, 1), 8)
    return tb, tk


def target_forward(x, fc, *, compute_dtype=None, tb=None, tk=None):
    """Fused (x @ fc) + L2-normalize(dim=-1), matching Target.forward.

    x : (B, D_in), fc : (D_in, D_out)  ->  (B, D_out) with unit L2 rows.
    compute_dtype: optionally cast x/fc (e.g. jnp.bfloat16 on v6e/v7x);
                   accumulation and the norm epilogue stay f32.
    """
    B, D_in = x.shape
    D_in2, D_out = fc.shape
    assert D_in == D_in2, "inner dims must match"
    out_dtype = x.dtype

    if compute_dtype is not None:
        x = x.astype(compute_dtype)
        fc = fc.astype(compute_dtype)

    in_itemsize = x.dtype.itemsize
    out_itemsize = jnp.dtype(out_dtype).itemsize

    # ---- lane/sublane alignment & tiling --------------------------------
    d_out_p = _round_up(D_out, 128)          # lane-dense output (single block)
    d_in_p = _round_up(D_in, 128)            # K padded to 128 multiple
    auto_tb, auto_tk = _pick_tiles(B, d_in_p, d_out_p, in_itemsize, out_itemsize)
    if tk is None:
        tk = auto_tk
    if tb is None:
        tb = auto_tb
    b_p = _round_up(B, tb)

    # Zero-padding is exact: padded K rows/cols contribute 0 to the matmul and
    # padded D_out columns contribute 0 to the row sum of squares.
    if b_p != B or d_in_p != D_in:
        x = jnp.pad(x, ((0, b_p - B), (0, d_in_p - D_in)))
    if d_in_p != D_in or d_out_p != D_out:
        fc = jnp.pad(fc, ((0, d_in_p - D_in), (0, d_out_p - D_out)))

    n_b = b_p // tb
    n_k = d_in_p // tk

    flops = 2 * B * D_in * D_out
    bytes_accessed = (
        b_p * d_in_p * in_itemsize
        + d_in_p * d_out_p * in_itemsize
        + b_p * d_out_p * out_itemsize
    )
    cost = pl.CostEstimate(
        flops=flops, transcendentals=B, bytes_accessed=bytes_accessed
    )

    # VMEM headroom: bump the scoped limit only when the estimate needs it.
    vmem_est = (2 * tb * tk * in_itemsize
                + 2 * tk * d_out_p * in_itemsize
                + 2 * tb * d_out_p * out_itemsize
                + tb * d_out_p * 4)
    vmem_limit = None
    if vmem_est > (20 << 20):
        vmem_limit = min(48 << 20, max(32 << 20, int(vmem_est * 3 // 2)))

    if n_k == 1:
        # --------- single-K fused path (no scratch accumulator) ----------
        out_p = pl.pallas_call(
            _target_kernel_single,
            out_shape=jax.ShapeDtypeStruct((b_p, d_out_p), out_dtype),
            grid_spec=pltpu.PrefetchScalarGridSpec(
                num_scalar_prefetch=0,
                grid=(n_b,),
                in_specs=[
                    pl.BlockSpec((tb, d_in_p), lambda i: (i, 0)),
                    pl.BlockSpec((d_in_p, d_out_p), lambda i: (0, 0)),
                ],
                out_specs=pl.BlockSpec((tb, d_out_p), lambda i: (i, 0)),
            ),
            compiler_params=pltpu.CompilerParams(
                dimension_semantics=("parallel",),
                vmem_limit_bytes=vmem_limit,
            ),
            cost_estimate=cost,
        )(x, fc)
    else:
        # --------- multi-K path with resident f32 accumulator ------------
        out_p = pl.pallas_call(
            _target_kernel_multi,
            out_shape=jax.ShapeDtypeStruct((b_p, d_out_p), out_dtype),
            grid_spec=pltpu.PrefetchScalarGridSpec(
                num_scalar_prefetch=0,
                grid=(n_b, n_k),
                in_specs=[
                    pl.BlockSpec((tb, tk), lambda i, k: (i, k)),
                    pl.BlockSpec((tk, d_out_p), lambda i, k: (k, 0)),
                ],
                out_specs=pl.BlockSpec((tb, d_out_p), lambda i, k: (i, 0)),
                scratch_shapes=[pltpu.VMEM((tb, d_out_p), jnp.float32)],
            ),
            compiler_params=pltpu.CompilerParams(
                # batch tiles independent -> 'parallel' (megacore);
                # K reduction with resident accumulator -> innermost 'arbitrary'.
                dimension_semantics=("parallel", "arbitrary"),
                vmem_limit_bytes=vmem_limit,
            ),
            cost_estimate=cost,
        )(x, fc)

    # Strip batch / feature padding (padded rows are NaN by construction).
    return out_p[:B, :D_out]


# ---------------------------------------------------------------------------
# Self-test
# ---------------------------------------------------------------------------
if __name__ == "__main__":
    key = jax.random.PRNGKey(0)
    k_x, k_fc, k_x2, k_fc2 = jax.random.split(key, 4)

    # --- small shapes consistent with the module (single-K fused path) ----
    B, D_in, D_out = 8, 32, 64
    x = jax.random.normal(k_x, (B, D_in), dtype=jnp.float32)
    fc = jax.random.normal(k_fc, (D_in, D_out), dtype=jnp.float32) * 0.05

    out = target_forward(x, fc)
    jax.block_until_ready(out)

    ref = x @ fc
    ref = ref / jnp.linalg.norm(ref, axis=-1, keepdims=True)
    assert out.shape == (B, D_out)
    assert jnp.allclose(out, ref, atol=1e-5, rtol=1e-5), "small-shape mismatch"

    # --- larger shapes exercising batch tiling, K reduction, and padding --
    B2, D_in2, D_out2 = 260, 640, 200        # multi-K path after padding
    x2 = jax.random.normal(k_x2, (B2, D_in2), dtype=jnp.float32)
    fc2 = jax.random.normal(k_fc2, (D_in2, D_out2), dtype=jnp.float32) * 0.02

    out2 = target_forward(x2, fc2)
    jax.block_until_ready(out2)

    ref2 = jnp.matmul(x2, fc2, precision=jax.lax.Precision.HIGHEST)
    ref2 = ref2 / jnp.linalg.norm(ref2, axis=-1, keepdims=True)
    assert out2.shape == (B2, D_out2)
    assert bool(jnp.all(jnp.isfinite(out2))), "non-finite output in tiled case"
    assert jnp.allclose(out2, ref2, atol=2e-2, rtol=2e-2), "tiled-shape mismatch"

    print("KERNEL_OK")
</pallas_src>

<mosaic_0001>
module attributes {stable_mosaic.version = 11 : i64} {
  func.func @_target_kernel_single(%arg0: i32, %arg1: memref<8x128xf32, #tpu.memory_space<vmem>>, %arg2: memref<128x128xf32, #tpu.memory_space<vmem>>, %arg3: memref<8x128xf32, #tpu.memory_space<vmem>>) attributes {dimension_semantics = [#tpu.dimension_semantics<parallel>], iteration_bounds = array<i64: 1>, scalar_prefetch = 0 : i64, scratch_operands = 0 : i64, tpu.core_type = #tpu.core_type<tc>, window_params = [{transform_indices = @transform_0, window_bounds = array<i64: 8, 128>}, {pipeline_mode = #tpu.pipeline_mode<synchronous>, transform_indices = @transform_1, window_bounds = array<i64: 128, 128>}, {transform_indices = @transform_2, window_bounds = array<i64: 8, 128>}]} {
    %c0 = arith.constant 0 : index
    %c0_0 = arith.constant 0 : index
    %0 = vector.load %arg1[%c0, %c0_0] : memref<8x128xf32, #tpu.memory_space<vmem>>, vector<8x128xf32>
    %c0_1 = arith.constant 0 : index
    %c0_2 = arith.constant 0 : index
    %1 = vector.load %arg2[%c0_1, %c0_2] : memref<128x128xf32, #tpu.memory_space<vmem>>, vector<128x128xf32>
    %cst = arith.constant dense<0.000000e+00> : vector<8x128xf32>
    %2 = tpu.matmul %0, %1, %cst {dimension_numbers = #tpu.dot_dimension_numbers<[1], [0], [0], [1], [0, 0, 1, 1], [], []>} : vector<8x128xf32>, vector<128x128xf32>, vector<8x128xf32> -> vector<8x128xf32>
    %3 = arith.mulf %2, %2 : vector<8x128xf32>
    %cst_3 = arith.constant dense<0.000000e+00> : vector<8xf32>
    %4 = vector.multi_reduction <add>, %3, %cst_3 [1] : vector<8x128xf32> to vector<8xf32>
    %5 = vector.shape_cast %4 : vector<8xf32> to vector<8x1xf32>
    %6 = math.rsqrt %5 : vector<8x1xf32>
    %7 = vector.broadcast %6 : vector<8x1xf32> to vector<8x128xf32>
    %8 = arith.mulf %2, %7 : vector<8x128xf32>
    %c0_4 = arith.constant 0 : index
    %c0_5 = arith.constant 0 : index
    %9 = vector.load %arg3[%c0_4, %c0_5] : memref<8x128xf32, #tpu.memory_space<vmem>>, vector<8x128xf32>
    tpu.vector_store %arg3[%c0_4, %c0_5], %8 {strides = array<i32>} : memref<8x128xf32, #tpu.memory_space<vmem>>, vector<8x128xf32>,
    return
  }
  func.func @transform_0(%arg0: i32) -> (i32, i32) {
    %c0_i32 = arith.constant 0 : i32
    %c0_i32_0 = arith.constant 0 : i32
    return %arg0, %c0_i32 : i32, i32
  }
  func.func @transform_1(%arg0: i32) -> (i32, i32) {
    %c0_i32 = arith.constant 0 : i32
    %c0_i32_0 = arith.constant 0 : i32
    %c0_i32_1 = arith.constant 0 : i32
    return %c0_i32, %c0_i32_0 : i32, i32
  }
  func.func @transform_2(%arg0: i32) -> (i32, i32) {
    %c0_i32 = arith.constant 0 : i32
    %c0_i32_0 = arith.constant 0 : i32
    return %arg0, %c0_i32 : i32, i32
  }
}

</mosaic_0001>

<bundles_post_ra>
// kernel: tpu_custom_call.1
= control target key start
LH: loop header
LB: loop body
LE: loop exit
PB: predicated region body
PF: predicated region fallthrough
CT: control target
= control target key end

     0   :  { %7 = vsyncpa [#allocation3], 0  ;;  %s371_s0 = inlined_call_operand.hbm [shape: f32[8,128], index: 0, kind: input, shape index: {}]   ;;  %s372_s1 = inlined_call_operand.hbm [shape: f32[128,128], index: 1, kind: input, shape index: {}]   ;;  %s373_s2 = inlined_call_operand.hbm [shape: f32[8,128], index: 2, kind: output, shape index: {}]  }
   0x1   :  { %8 = vsyncpa [#allocation6], 0 }
   0x2   :  { %9 = vsyncpa [#allocation4], 0  ;;  %s305_s9 = smov [#allocation2]   ;;  %s306_s11 = smov [#allocation5]  }
   0x3   :  { %s16_s10 = sshll.u32 %s305_s9, 4  ;;  %s25_s12 = sshll.u32 %s306_s11, 4  ;;  %s17_s10 = int_to_ptr.vmem [resolvable:$true] %s16_s10  ;;  %s328_s12 = int_to_ptr.vmem [resolvable:$true] %s25_s12 }
   0x4   :  { %s233_s15 = scalar_lea.hbm %s371_s0, 128 }
   0x5   :  { %p234_p0 = scmp.ne.s32.totalorder %s371_s0, %s233_s15  ;;  %p237_p1 = scmp.lt.u32.totalorder %s233_s15, %s371_s0 }
   0x7   :  { %p239_p2 = pnand %p237_p1, %p234_p0 }
   0x9   :  { %242 = shalt.err (!%p239_p2)
}
   0xa   :  { %s243_s20 = scalar_lea.vmem %s17_s10, 128  ;;  %p248_p4 = scmp.lt.s32.totalorder %s17_s10, %s17_s10 }
   0xb   :  { %p244_p3 = scmp.ne.s32.totalorder %s17_s10, %s243_s20  ;;  %p249_p5 = scmp.lt.s32.totalorder %s243_s20, %s243_s20 }
   0xd   :  { %p250_p6 = por %p249_p5, %p248_p4 }
   0xf   :  { %p251_p7 = pnand %p250_p6, %p244_p3 }
  0x11   :  { %254 = shalt.err (!%p251_p7)
}
  0x12   :  { %19 = dma.hbm_to_vmem [thread:$0]  %s371_s0, 128, %s17_s10, [#allocation3]  }
  0x13   :  { %s255_s25 = scalar_lea.hbm %s372_s1, 2048 }
  0x14   :  { %p256_p8 = scmp.ne.s32.totalorder %s372_s1, %s255_s25  ;;  %p259_p9 = scmp.lt.u32.totalorder %s255_s25, %s372_s1 }
  0x16   :  { %p261_p10 = pnand %p259_p9, %p256_p8 }
  0x18   :  { %264 = shalt.err (!%p261_p10)
}
  0x19   :  { %s265_s30 = scalar_lea.vmem %s328_s12, 2048  ;;  %p270_p12 = scmp.lt.s32.totalorder %s328_s12, %s328_s12 }
  0x1a   :  { %p266_p11 = scmp.ne.s32.totalorder %s328_s12, %s265_s30  ;;  %p271_p13 = scmp.lt.s32.totalorder %s265_s30, %s265_s30 }
  0x1c   :  { %p272_p0 = por %p271_p13, %p270_p12 }
  0x1e   :  { %p273_p1 = pnand %p272_p0, %p266_p11 }
  0x20   :  { %276 = shalt.err (!%p273_p1)
}
  0x21   :  { %s307_s0 = smov 128   ;;  %s308_s3 = smov 8  }
  0x22   :  { %31 = dma.hbm_to_vmem [thread:$0]  %s372_s1, 2048, %s328_s12, [#allocation6], %s307_s0, %s307_s0, %s308_s3  }
  0x23   :  { %299 = dma.done.wait [#allocation3], 128  }
  0x24   :  { %300 = vsyncadd [#allocation3], 4294967168 }
  0x25   :  { %301 = dma.done.wait [#allocation6], 2048  }
  0x26   :  { %302 = vsyncadd [#allocation6], 4294965248  ;;  %v309_v0 = vmov 0.0|0.0   ;;  %vm310_vm0 = vmmov 0   ;;  %v311_v1 = vmov 0.0   ;;  %v39_v2 = vld [vmem:[#allocation5] sm:$0xff] }
  0x27   :  { %199 = vmatprep.subr.bf16.mxu0 %v309_v0  ;;  %196 = vmatprep.mubr.msk.f32.mxu0 %vm310_vm0, %v311_v1  ;;  %v40_v3 = vld [vmem:[#allocation5 + $0x8] sm:$0xff]  ;;  %v41_v4 = vld [vmem:[#allocation5 + $0x10] sm:$0xff]  ;;  %v42_v6 = vld [vmem:[#allocation5 + $0x18] sm:$0xff]  ;;  %s312_s1 = smov [#allocation7]  }
  0x28   :  { %v200_v5 = vpack.c.bf16 %v40_v3, %v39_v2  ;;  %v203_v7 = vpack.c.bf16 %v42_v6, %v41_v4  ;;  %v43_v8 = vld [vmem:[#allocation5 + $0x20] sm:$0xff]  ;;  %v44_v9 = vld [vmem:[#allocation5 + $0x28] sm:$0xff]  ;;  %v45_v11 = vld [vmem:[#allocation5 + $0x30] sm:$0xff]  ;;  %s137_s6 = sshll.u32 %s312_s1, 4  ;;  %s138_s6 = int_to_ptr.vmem [resolvable:$true] %s137_s6 }
  0x29   :  { %v206_v10 = vpack.c.bf16 %v44_v9, %v43_v8  ;;  %v46_v12 = vld [vmem:[#allocation5 + $0x38] sm:$0xff]  ;;  %v47_v14 = vld [vmem:[#allocation5 + $0x40] sm:$0xff]  ;;  %v48_v15 = vld [vmem:[#allocation5 + $0x48] sm:$0xff]  ;;  %s277_s7 = scalar_lea.vmem %s138_s6, 128  ;;  %p282_p3 = scmp.lt.s32.totalorder %s138_s6, %s138_s6 }
  0x2a   :  { %201 = vmatpush3.bf16.msra.mxu0 %v200_v5  ;;  %v209_v13 = vpack.c.bf16 %v46_v12, %v45_v11  ;;  %v212_v16 = vpack.c.bf16 %v48_v15, %v47_v14  ;;  %v49_v17 = vld [vmem:[#allocation5 + $0x50] sm:$0xff]  ;;  %v50_v18 = vld [vmem:[#allocation5 + $0x58] sm:$0xff]  ;;  %v51_v20 = vld [vmem:[#allocation5 + $0x60] sm:$0xff]  ;;  %p278_p2 = scmp.ne.s32.totalorder %s138_s6, %s277_s7  ;;  %p283_p4 = scmp.lt.s32.totalorder %s277_s7, %s277_s7 }
  0x2b   :  { %202 = vmatprep.subr.bf16.mxu0 %v309_v0  ;;  %v215_v19 = vpack.c.bf16 %v50_v18, %v49_v17  ;;  %v52_v21 = vld [vmem:[#allocation5 + $0x68] sm:$0xff]  ;;  %v53_v23 = vld [vmem:[#allocation5 + $0x70] sm:$0xff]  ;;  %v54_v24 = vld [vmem:[#allocation5 + $0x78] sm:$0xff] }
  0x2c   :  { %v218_v22 = vpack.c.bf16 %v52_v21, %v51_v20  ;;  %v221_v25 = vpack.c.bf16 %v54_v24, %v53_v23  ;;  %v38_v26 = vld [vmem:[#allocation2] sm:$0xff]  ;;  %p284_p5 = por %p283_p4, %p282_p3 }
  0x2e   :  { %204 = vmatpush3.bf16.msra.mxu0 %v203_v7  ;;  %p285_p6 = pnand %p284_p5, %p278_p2 }
  0x2f   :  { %205 = vmatprep.subr.bf16.mxu0 %v309_v0 }
  0x32   :  { %207 = vmatpush3.bf16.msra.mxu0 %v206_v10 }
  0x33   :  { %208 = vmatprep.subr.bf16.mxu0 %v309_v0 }
  0x36   :  { %210 = vmatpush3.bf16.msra.mxu0 %v209_v13 }
  0x37   :  { %211 = vmatprep.subr.bf16.mxu0 %v309_v0 }
  0x3a   :  { %213 = vmatpush3.bf16.msra.mxu0 %v212_v16 }
  0x3b   :  { %214 = vmatprep.subr.bf16.mxu0 %v309_v0 }
  0x3e   :  { %216 = vmatpush3.bf16.msra.mxu0 %v215_v19 }
  0x3f   :  { %217 = vmatprep.subr.bf16.mxu0 %v309_v0 }
  0x42   :  { %219 = vmatpush3.bf16.msra.mxu0 %v218_v22 }
  0x43   :  { %220 = vmatprep.subr.bf16.mxu0 %v309_v0 }
  0x46   :  { %222 = vmatpush3.bf16.msra.mxu0 %v221_v25 }
  0x49   :  { %197 = vmatmul.mubr.f32.vlgmr.msra.gmra.mrb[0].mxu0 %v38_v26 }
 0x11c   :  { %v121_v27 = vpop.f32.mrb[0].mxu0 }
 0x11d   :  { %v198_v28 = vpop.f32.mrb[1].mxu0  ;;  %v125_v29 = vmul.f32 %v121_v27, %v121_v27 }
 0x11f   :  { %126 = vadd.xlane.f32.xlu0 %v125_v29 }
 0x1ac   :  { %v127_v30 = vpop.xlane.xlu0 %126 }
 0x1ad   :  { %231 = vrsqrt.f32 %v127_v30 }
 0x1b7   :  { %v232_v31 = vpop.eup %231 }
 0x1b8   :  { %v129_v32 = vmul.f32 %v232_v31, %v121_v27 }
 0x1ba   :  { %130 = vst [vmem:[#allocation7] sm:$0xff] %v129_v32 }
 0x1bb   :  { %288 = shalt.err (!%p285_p6)
}
 0x1bc   :  { %s289_s10 = scalar_lea.hbm %s373_s2, 128 }
 0x1bd   :  { %p290_p7 = scmp.ne.s32.totalorder %s373_s2, %s289_s10  ;;  %p293_p8 = scmp.lt.u32.totalorder %s289_s10, %s373_s2 }
 0x1bf   :  { %p295_p9 = pnand %p293_p8, %p290_p7 }
 0x1c1   :  { %298 = shalt.err (!%p295_p9)
}
 0x1c2   :  { %140 = dma.vmem_to_hbm [thread:$0]  %s138_s6, 128, %s373_s2, [#allocation4]  }
 0x1c3   :  { %303 = dma.done.wait [#allocation4], 128  }
 0x1c4   :  { %304 = vsyncadd [#allocation4], 4294967168 }
 0x1c5   :  { %144 = vsyncpa [#allocation3], 1 }
 0x1c6   :  { %145 = vsyncpa [#allocation6], 1 }
 0x1c7   :  { %146 = vsyncpa [#allocation4], 1 }

</bundles_post_ra>
